<compile_context>
chip_gen: v6e
topology: v6e:2x2x1
jax: 0.10.0
libtpu: 0.0.40
codegen_flags: <defaults>
</compile_context>

<pallas_src>
import jax
import jax.numpy as jnp
from jax.experimental import pallas as pl
from jax.experimental.pallas import tpu as pltpu


def _round_up(x, m):
    return ((x + m - 1) // m) * m


def _cdiv(a, b):
    return -(-a // b)


def actor_mlp_kernel(x_ref, w1_ref, b1_ref, w2_ref, b2_ref, w3_ref, b3_ref,
                     probs_ref):
    # Layer 1: (tb, D)bf16 @ (D, H1)bf16 -> f32 acc; bias + ReLU folded with
    # the bf16 cast of the next layer's LHS (no extra temporaries).
    h1 = jnp.maximum(
        jnp.dot(x_ref[...], w1_ref[...], preferred_element_type=jnp.float32)
        + b1_ref[...], 0.0).astype(jnp.bfloat16)

    # Layer 2: (tb, H1)bf16 @ (H1, H2)bf16 -> f32 acc; bias + ReLU + cast.
    h2 = jnp.maximum(
        jnp.dot(h1, w2_ref[...], preferred_element_type=jnp.float32)
        + b2_ref[...], 0.0).astype(jnp.bfloat16)

    # Output layer (lane-padded to Ap columns; padded columns carry a -1e30
    # bias so exp() underflows to exactly 0 and real probabilities are exact).
    logits = jnp.dot(h2, w3_ref[...], preferred_element_type=jnp.float32)
    logits = logits + b3_ref[...]

    # Numerically stable softmax(dim=-1) in f32.  Exact divide on the (tb, 1)
    # denominator (negligible cost) so each row sums to 1 to f32 accuracy
    # before the bf16 store.
    m = jnp.max(logits, axis=-1, keepdims=True)
    e = jnp.exp(logits - m)
    inv = 1.0 / jnp.sum(e, axis=-1, keepdims=True)
    probs_ref[...] = (e * inv).astype(probs_ref.dtype)


def _const_spec(shape):
    """BlockSpec for a grid-invariant operand: fetched once, single-buffered."""
    index_map = lambda i: (0,) * len(shape)
    try:
        return pl.BlockSpec(shape, index_map, pipeline_mode=pl.Buffered(1))
    except Exception:  # pragma: no cover - jax without pipeline_mode support
        return pl.BlockSpec(shape, index_map)


def actor_forward(state, params, *, tile_b=512):
    """Categorical probabilities for the PPO actor, shape (batch, n_actions)."""
    w1, b1, w2, b2, w3, b3 = params
    B, D = state.shape
    H1 = w1.shape[1]
    H2 = w2.shape[1]
    A = w3.shape[1]

    # --- Batch tiling.  tile_b=512 amortises the per-grid-step pipeline cost
    # (sweep 256-1024).  Round to 16 sublanes: the state tile is bf16, whose
    # native packing is (16, 128).
    tb = min(tile_b, _round_up(B, 16))
    n_steps = _cdiv(B, tb)
    if n_steps > 1 and n_steps % 2 == 1:
        # v7x shares the "parallel" grid axis between 2 TensorCores; an odd
        # step count leaves one core a step short.  Shrink the tile just
        # enough to make the count even (single-tile batches are untouched
        # and keep the largest tile, which is right for v5e/v6e).
        tb = _round_up(_cdiv(B, n_steps + 1), 16)
        n_steps = _cdiv(B, tb)
    Bp = tb * n_steps
    if Bp != B:
        state = jnp.pad(state, ((0, Bp - B), (0, 0)))

    # --- Lane-dense output: pad n_actions to a multiple of 128 (the minimum
    # lane-dense width; padding further would only multiply layer-3 work).
    # Padded logits get a -1e30 bias so exp() underflows to exactly 0.
    Ap = _round_up(A, 128)
    if Ap != A:
        w3 = jnp.pad(w3, ((0, 0), (0, Ap - A)))
        b3 = jnp.pad(b3, ((0, 0), (0, Ap - A)), constant_values=-1e30)

    # --- bf16 matmul operands (MXU-native); biases stay f32.
    x_bf = state.astype(jnp.bfloat16)
    w1_bf = w1.astype(jnp.bfloat16)
    w2_bf = w2.astype(jnp.bfloat16)
    w3_bf = w3.astype(jnp.bfloat16)
    b1_f = b1.astype(jnp.float32)
    b2_f = b2.astype(jnp.float32)
    b3_f = b3.astype(jnp.float32)

    probs_padded = pl.pallas_call(
        actor_mlp_kernel,
        # bf16 output halves the padded-output HBM writeback while keeping an
        # unmasked full-lane store; the wrapper slices/casts the real columns.
        out_shape=jax.ShapeDtypeStruct((Bp, Ap), jnp.bfloat16),
        grid_spec=pltpu.PrefetchScalarGridSpec(
            num_scalar_prefetch=0,
            grid=(n_steps,),
            in_specs=[
                pl.BlockSpec((tb, D), lambda i: (i, 0)),  # state tile
                _const_spec((D, H1)),                     # w1 (whole)
                _const_spec((1, H1)),                     # b1
                _const_spec((H1, H2)),                    # w2
                _const_spec((1, H2)),                     # b2
                _const_spec((H2, Ap)),                    # w3 (lane-padded)
                _const_spec((1, Ap)),                     # b3 (lane-padded)
            ],
            out_specs=pl.BlockSpec((tb, Ap), lambda i: (i, 0)),
        ),
        compiler_params=pltpu.CompilerParams(
            dimension_semantics=("parallel",)),
    )(x_bf, w1_bf, b1_f, w2_bf, b2_f, w3_bf, b3_f)

    # D (=input_dims) is kept un-padded: the K=16 matmul under-fills the MXU
    # but is ~2% of total FLOPs; padding it 8-16x buys nothing.
    return probs_padded[:B, :A].astype(jnp.float32)


def actor_forward_ref(state, params):
    """Pure-JAX reference with the same bf16-operand / f32-accumulate scheme."""
    w1, b1, w2, b2, w3, b3 = params
    x = state.astype(jnp.bfloat16)
    h1 = jnp.maximum(
        jnp.dot(x, w1.astype(jnp.bfloat16),
                preferred_element_type=jnp.float32) + b1, 0.0)
    h2 = jnp.maximum(
        jnp.dot(h1.astype(jnp.bfloat16), w2.astype(jnp.bfloat16),
                preferred_element_type=jnp.float32) + b2, 0.0)
    logits = jnp.dot(h2.astype(jnp.bfloat16), w3.astype(jnp.bfloat16),
                     preferred_element_type=jnp.float32) + b3
    return jax.nn.softmax(logits, axis=-1)


def init_params(key, input_dims, fc1_dims, fc2_dims, n_actions):
    """Deterministic PyTorch-Linear-style (Kaiming-uniform-ish) init."""
    ks = jax.random.split(key, 6)

    def lin(kw, kb, fan_in, fan_out):
        bound = 1.0 / jnp.sqrt(fan_in)
        w = jax.random.uniform(kw, (fan_in, fan_out), jnp.float32, -bound, bound)
        b = jax.random.uniform(kb, (1, fan_out), jnp.float32, -bound, bound)
        return w, b

    w1, b1 = lin(ks[0], ks[1], input_dims, fc1_dims)
    w2, b2 = lin(ks[2], ks[3], fc1_dims, fc2_dims)
    w3, b3 = lin(ks[4], ks[5], fc2_dims, n_actions)
    return (w1, b1, w2, b2, w3, b3)


if __name__ == "__main__":
    # Module-consistent shapes: input_dims=16, fc1=fc2=256 (defaults), 4 actions.
    D, H1, H2, A = 16, 256, 256, 4

    key = jax.random.PRNGKey(0)
    k_params, k_state = jax.random.split(key)
    params = init_params(k_params, D, H1, H2, A)

    # B=5  : exercises the ragged-batch pad-to-16 path.
    # B=256: single large tile (largest-tile path).
    # B=1200: spans multiple tiles and triggers the even-grid-step split
    #         (3 odd steps of 512 -> 4 steps of 304).
    for B in (5, 256, 1200):
        state = jax.random.normal(jax.random.fold_in(k_state, B), (B, D),
                                  jnp.float32)
        probs = jax.block_until_ready(actor_forward(state, params))
        ref = actor_forward_ref(state, params)
        assert probs.shape == (B, A)
        # bf16 output store: per-probability quantisation error <= ~2e-3.
        assert jnp.allclose(probs, ref, atol=5e-3, rtol=2e-2), (
            f"mismatch at B={B}: max abs err "
            f"{jnp.max(jnp.abs(probs - ref)):.3e}")
        assert jnp.allclose(jnp.sum(probs, axis=-1), 1.0, atol=2e-2), (
            f"row sums off at B={B}: "
            f"{jnp.max(jnp.abs(jnp.sum(probs, axis=-1) - 1.0)):.3e}")

    # TODO(synk): torch.distributions.Categorical (sampling / log_prob) and the
    # Adam optimizer / checkpoint I/O have no Pallas equivalent here; the
    # kernel produces the Categorical's probability vector.
    print("KERNEL_OK")
</pallas_src>

<mosaic_0001>
module attributes {stable_mosaic.version = 11 : i64} {
  func.func @actor_mlp_kernel(%arg0: i32, %arg1: memref<16x16xbf16, #tpu.memory_space<vmem>>, %arg2: memref<16x256xbf16, #tpu.memory_space<vmem>>, %arg3: memref<1x256xf32, #tpu.memory_space<vmem>>, %arg4: memref<256x256xbf16, #tpu.memory_space<vmem>>, %arg5: memref<1x256xf32, #tpu.memory_space<vmem>>, %arg6: memref<256x128xbf16, #tpu.memory_space<vmem>>, %arg7: memref<1x128xf32, #tpu.memory_space<vmem>>, %arg8: memref<16x128xbf16, #tpu.memory_space<vmem>>) attributes {dimension_semantics = [#tpu.dimension_semantics<parallel>], iteration_bounds = array<i64: 1>, scalar_prefetch = 0 : i64, scratch_operands = 0 : i64, tpu.core_type = #tpu.core_type<tc>, window_params = [{transform_indices = @transform_0, window_bounds = array<i64: 16, 16>}, {pipeline_mode = #tpu.pipeline_mode<synchronous>, transform_indices = @transform_1, window_bounds = array<i64: 16, 256>}, {pipeline_mode = #tpu.pipeline_mode<synchronous>, transform_indices = @transform_2, window_bounds = array<i64: 1, 256>}, {pipeline_mode = #tpu.pipeline_mode<synchronous>, transform_indices = @transform_3, window_bounds = array<i64: 256, 256>}, {pipeline_mode = #tpu.pipeline_mode<synchronous>, transform_indices = @transform_4, window_bounds = array<i64: 1, 256>}, {pipeline_mode = #tpu.pipeline_mode<synchronous>, transform_indices = @transform_5, window_bounds = array<i64: 256, 128>}, {pipeline_mode = #tpu.pipeline_mode<synchronous>, transform_indices = @transform_6, window_bounds = array<i64: 1, 128>}, {transform_indices = @transform_7, window_bounds = array<i64: 16, 128>}]} {
    %c0 = arith.constant 0 : index
    %c0_0 = arith.constant 0 : index
    %0 = vector.load %arg1[%c0, %c0_0] : memref<16x16xbf16, #tpu.memory_space<vmem>>, vector<16x16xbf16>
    %c0_1 = arith.constant 0 : index
    %c0_2 = arith.constant 0 : index
    %1 = vector.load %arg2[%c0_1, %c0_2] : memref<16x256xbf16, #tpu.memory_space<vmem>>, vector<16x256xbf16>
    %cst = arith.constant dense<0.000000e+00> : vector<16x256xf32>
    %2 = tpu.matmul %0, %1, %cst {dimension_numbers = #tpu.dot_dimension_numbers<[1], [0], [0], [1], [0, 0, 1, 1], [], []>} : vector<16x16xbf16>, vector<16x256xbf16>, vector<16x256xf32> -> vector<16x256xf32>
    %c0_3 = arith.constant 0 : index
    %c0_4 = arith.constant 0 : index
    %3 = vector.load %arg3[%c0_3, %c0_4] : memref<1x256xf32, #tpu.memory_space<vmem>>, vector<1x256xf32>
    %4 = vector.broadcast %3 : vector<1x256xf32> to vector<16x256xf32>
    %5 = arith.addf %2, %4 : vector<16x256xf32>
    %cst_5 = arith.constant 0.000000e+00 : f32
    %6 = vector.broadcast %cst_5 : f32 to vector<16x256xf32>
    %7 = arith.maximumf %5, %6 : vector<16x256xf32>
    %8 = arith.truncf %7 : vector<16x256xf32> to vector<16x256xbf16>
    %c0_6 = arith.constant 0 : index
    %c0_7 = arith.constant 0 : index
    %9 = vector.load %arg4[%c0_6, %c0_7] : memref<256x256xbf16, #tpu.memory_space<vmem>>, vector<256x256xbf16>
    %cst_8 = arith.constant dense<0.000000e+00> : vector<16x256xf32>
    %10 = tpu.matmul %8, %9, %cst_8 {dimension_numbers = #tpu.dot_dimension_numbers<[1], [0], [0], [1], [0, 0, 1, 1], [], []>} : vector<16x256xbf16>, vector<256x256xbf16>, vector<16x256xf32> -> vector<16x256xf32>
    %c0_9 = arith.constant 0 : index
    %c0_10 = arith.constant 0 : index
    %11 = vector.load %arg5[%c0_9, %c0_10] : memref<1x256xf32, #tpu.memory_space<vmem>>, vector<1x256xf32>
    %12 = vector.broadcast %11 : vector<1x256xf32> to vector<16x256xf32>
    %13 = arith.addf %10, %12 : vector<16x256xf32>
    %cst_11 = arith.constant 0.000000e+00 : f32
    %14 = vector.broadcast %cst_11 : f32 to vector<16x256xf32>
    %15 = arith.maximumf %13, %14 : vector<16x256xf32>
    %16 = arith.truncf %15 : vector<16x256xf32> to vector<16x256xbf16>
    %c0_12 = arith.constant 0 : index
    %c0_13 = arith.constant 0 : index
    %17 = vector.load %arg6[%c0_12, %c0_13] : memref<256x128xbf16, #tpu.memory_space<vmem>>, vector<256x128xbf16>
    %cst_14 = arith.constant dense<0.000000e+00> : vector<16x128xf32>
    %18 = tpu.matmul %16, %17, %cst_14 {dimension_numbers = #tpu.dot_dimension_numbers<[1], [0], [0], [1], [0, 0, 1, 1], [], []>} : vector<16x256xbf16>, vector<256x128xbf16>, vector<16x128xf32> -> vector<16x128xf32>
    %c0_15 = arith.constant 0 : index
    %c0_16 = arith.constant 0 : index
    %19 = vector.load %arg7[%c0_15, %c0_16] : memref<1x128xf32, #tpu.memory_space<vmem>>, vector<1x128xf32>
    %20 = vector.broadcast %19 : vector<1x128xf32> to vector<16x128xf32>
    %21 = arith.addf %18, %20 : vector<16x128xf32>
    %cst_17 = arith.constant dense<0xFF800000> : vector<16xf32>
    %22 = vector.multi_reduction <maximumf>, %21, %cst_17 [1] : vector<16x128xf32> to vector<16xf32>
    %23 = vector.shape_cast %22 : vector<16xf32> to vector<16x1xf32>
    %24 = vector.broadcast %23 : vector<16x1xf32> to vector<16x128xf32>
    %25 = arith.subf %21, %24 : vector<16x128xf32>
    %26 = math.exp %25 : vector<16x128xf32>
    %cst_18 = arith.constant dense<0.000000e+00> : vector<16xf32>
    %27 = vector.multi_reduction <add>, %26, %cst_18 [1] : vector<16x128xf32> to vector<16xf32>
    %28 = vector.shape_cast %27 : vector<16xf32> to vector<16x1xf32>
    %cst_19 = arith.constant 1.000000e+00 : f32
    %29 = vector.broadcast %cst_19 : f32 to vector<16x1xf32>
    %30 = arith.divf %29, %28 : vector<16x1xf32>
    %31 = vector.broadcast %30 : vector<16x1xf32> to vector<16x128xf32>
    %32 = arith.mulf %26, %31 : vector<16x128xf32>
    %33 = arith.truncf %32 : vector<16x128xf32> to vector<16x128xbf16>
    %c0_20 = arith.constant 0 : index
    %c0_21 = arith.constant 0 : index
    %34 = vector.load %arg8[%c0_20, %c0_21] : memref<16x128xbf16, #tpu.memory_space<vmem>>, vector<16x128xbf16>
    tpu.vector_store %arg8[%c0_20, %c0_21], %33 {strides = array<i32>} : memref<16x128xbf16, #tpu.memory_space<vmem>>, vector<16x128xbf16>,
    return
  }
  func.func @transform_0(%arg0: i32) -> (i32, i32) {
    %c0_i32 = arith.constant 0 : i32
    %c0_i32_0 = arith.constant 0 : i32
    return %arg0, %c0_i32 : i32, i32
  }
  func.func @transform_1(%arg0: i32) -> (i32, i32) {
    %c0_i32 = arith.constant 0 : i32
    %c0_i32_0 = arith.constant 0 : i32
    %c0_i32_1 = arith.constant 0 : i32
    return %c0_i32, %c0_i32_0 : i32, i32
  }
  func.func @transform_2(%arg0: i32) -> (i32, i32) {
    %c0_i32 = arith.constant 0 : i32
    %c0_i32_0 = arith.constant 0 : i32
    %c0_i32_1 = arith.constant 0 : i32
    return %c0_i32, %c0_i32_0 : i32, i32
  }
  func.func @transform_3(%arg0: i32) -> (i32, i32) {
    %c0_i32 = arith.constant 0 : i32
    %c0_i32_0 = arith.constant 0 : i32
    %c0_i32_1 = arith.constant 0 : i32
    return %c0_i32, %c0_i32_0 : i32, i32
  }
  func.func @transform_4(%arg0: i32) -> (i32, i32) {
    %c0_i32 = arith.constant 0 : i32
    %c0_i32_0 = arith.constant 0 : i32
    %c0_i32_1 = arith.constant 0 : i32
    return %c0_i32, %c0_i32_0 : i32, i32
  }
  func.func @transform_5(%arg0: i32) -> (i32, i32) {
    %c0_i32 = arith.constant 0 : i32
    %c0_i32_0 = arith.constant 0 : i32
    %c0_i32_1 = arith.constant 0 : i32
    return %c0_i32, %c0_i32_0 : i32, i32
  }
  func.func @transform_6(%arg0: i32) -> (i32, i32) {
    %c0_i32 = arith.constant 0 : i32
    %c0_i32_0 = arith.constant 0 : i32
    %c0_i32_1 = arith.constant 0 : i32
    return %c0_i32, %c0_i32_0 : i32, i32
  }
  func.func @transform_7(%arg0: i32) -> (i32, i32) {
    %c0_i32 = arith.constant 0 : i32
    %c0_i32_0 = arith.constant 0 : i32
    return %arg0, %c0_i32 : i32, i32
  }
}

</mosaic_0001>

<bundles_post_ra>
// kernel: tpu_custom_call.1
= control target key start
LH: loop header
LB: loop body
LE: loop exit
PB: predicated region body
PF: predicated region fallthrough
CT: control target
= control target key end

     0   :  { %12 = vsyncpa [#allocation3], 0  ;;  %s1012_s0 = inlined_call_operand.hbm [shape: bf16[16,16], index: 0, kind: input, shape index: {}]   ;;  %s1013_s1 = inlined_call_operand.hbm [shape: bf16[16,256], index: 1, kind: input, shape index: {}]   ;;  %s1014_s2 = inlined_call_operand.vmem [shape: f32[1,256], index: 2, kind: input, shape index: {}]   ;;  %s1015_s3 = inlined_call_operand.hbm [shape: bf16[256,256], index: 3, kind: input, shape index: {}]   ;;  %s1016_s4 = inlined_call_operand.vmem [shape: f32[1,256], index: 4, kind: input, shape index: {}]   ;;  %s1017_s5 = inlined_call_operand.hbm [shape: bf16[256,128], index: 5, kind: input, shape index: {}]   ;;  %s1018_s6 = inlined_call_operand.vmem [shape: f32[1,128], index: 6, kind: input, shape index: {}]   ;;  %s1019_s7 = inlined_call_operand.hbm [shape: bf16[16,128], index: 7, kind: output, shape index: {}]  }
   0x1   :  { %13 = vsyncpa [#allocation6], 0 }
   0x2   :  { %14 = vsyncpa [#allocation9], 0 }
   0x3   :  { %15 = vsyncpa [#allocation4], 0  ;;  %s923_s24 = smov [#allocation5]  }
   0x4   :  { %s33_s25 = sshll.u32 %s923_s24, 4  ;;  %s34_s25 = int_to_ptr.vmem [resolvable:$true] %s33_s25 }
   0x5   :  { %s823_s26 = scalar_lea.vmem %s34_s25, 256  ;;  %p828_p1 = scmp.lt.s32.totalorder %s34_s25, %s34_s25 }
   0x6   :  { %p824_p0 = scmp.ne.s32.totalorder %s34_s25, %s823_s26  ;;  %p829_p2 = scmp.lt.s32.totalorder %s823_s26, %s823_s26 }
   0x8   :  { %p830_p3 = por %p829_p2, %p828_p1 }
   0xa   :  { %p831_p4 = pnand %p830_p3, %p824_p0 }
   0xc   :  { %834 = shalt.err (!%p831_p4)
}
   0xd   :  { %s924_s27 = smov 128   ;;  %s925_s28 = smov 8  }
   0xe   :  { %39 = dma.hbm_to_vmem [thread:$0]  %s1013_s1, 256, %s34_s25, [#allocation6], %s924_s27, %s924_s27, %s925_s28  }
   0xf   :  { %s926_s8 = smov [#allocation2]  }
  0x10   :  { %s21_s9 = sshll.u32 %s926_s8, 4  ;;  %s22_s9 = int_to_ptr.vmem [resolvable:$true] %s21_s9 }
  0x11   :  { %s843_s10 = scalar_lea.vmem %s22_s9, 128  ;;  %p848_p6 = scmp.lt.s32.totalorder %s22_s9, %s22_s9 }
  0x12   :  { %p844_p5 = scmp.ne.s32.totalorder %s22_s9, %s843_s10  ;;  %p849_p7 = scmp.lt.s32.totalorder %s843_s10, %s843_s10 }
  0x14   :  { %p850_p8 = por %p849_p7, %p848_p6 }
  0x16   :  { %p851_p9 = pnand %p850_p8, %p844_p5 }
  0x18   :  { %854 = shalt.err (!%p851_p9)
}
  0x19   :  { %s927_s11 = smov 64   ;;  %s928_s12 = smov 4  }
  0x1a   :  { %27 = dma.hbm_to_vmem [thread:$0]  %s1012_s0, 128, %s22_s9, [#allocation3], %s927_s11, %s927_s11, %s928_s12  }
  0x1b   :  { %s929_s1 = smov [#allocation7]   ;;  %s930_s16 = smov [#allocation8]  }
  0x1c   :  { %s47_s15 = sshll.u32 %s929_s1, 4  ;;  %s61_s17 = sshll.u32 %s930_s16, 4  ;;  %s48_s15 = int_to_ptr.vmem [resolvable:$true] %s47_s15  ;;  %s62_s17 = int_to_ptr.vmem [resolvable:$true] %s61_s17 }
  0x1d   :  { %s863_s18 = scalar_lea.vmem %s48_s15, 4096  ;;  %p868_p11 = scmp.lt.s32.totalorder %s48_s15, %s48_s15 }
  0x1e   :  { %p864_p10 = scmp.ne.s32.totalorder %s48_s15, %s863_s18  ;;  %p869_p12 = scmp.lt.s32.totalorder %s863_s18, %s863_s18 }
  0x20   :  { %p870_p13 = por %p869_p12, %p868_p11 }
  0x22   :  { %p871_p0 = pnand %p870_p13, %p864_p10 }
  0x24   :  { %874 = shalt.err (!%p871_p0)
}
  0x25   :  { %53 = dma.hbm_to_vmem [thread:$0]  %s1015_s3, 4096, %s48_s15, [#allocation6], %s924_s27, %s924_s27, %s925_s28  }
  0x26   :  { %s883_s0 = scalar_lea.vmem %s62_s17, 2048  ;;  %p888_p2 = scmp.lt.s32.totalorder %s62_s17, %s62_s17 }
  0x27   :  { %p884_p1 = scmp.ne.s32.totalorder %s62_s17, %s883_s0  ;;  %p889_p3 = scmp.lt.s32.totalorder %s883_s0, %s883_s0 }
  0x29   :  { %p890_p4 = por %p889_p3, %p888_p2 }
  0x2b   :  { %p891_p5 = pnand %p890_p4, %p884_p1 }
  0x2d   :  { %894 = shalt.err (!%p891_p5)
}
  0x2e   :  { %67 = dma.hbm_to_vmem [thread:$0]  %s1017_s5, 2048, %s62_s17, [#allocation9], %s927_s11, %s927_s11, %s928_s12  }
  0x2f   :  { %915 = dma.done.wait [#allocation3], 128  }
  0x30   :  { %916 = vsyncadd [#allocation3], 4294967168 }
  0x31   :  { %917 = dma.done.wait [#allocation6], 4352  }
  0x32   :  { %918 = vsyncadd [#allocation6], 4294962944 }
  0x33   :  { %919 = dma.done.wait [#allocation9], 2048  }
  0x34   :  { %920 = vsyncadd [#allocation9], 4294965248  ;;  %v931_v0 = vmov 0   ;;  %v739_v1 = vld [vmem:[#allocation5 + $0x4] ss:$8 sps:$4 sm:$0xff]   ;;  %v742_v3 = vld [vmem:[#allocation2] sm:$0xff]   ;;  %v89_v46 = vlaneseq }
  0x35   :  { %150 = vmatprep.mubr.bf16.mxu0 %v931_v0  ;;  %v741_v2 = vld [vmem:[#allocation5] ss:$8 sps:$4 sm:$0xff]   ;;  %132 = vmatprep.subr.bf16.mxu0 %v739_v1  ;;  %vm114_vm0 = vcmask 130048   ;;  %v743_v4 = vld [vmem:[#allocation7 + $0x74] ss:$8 sps:$4 sm:$0xff]   ;;  %v795_v40 = vld [vmem:[#allocation8 + $0x68] sm:$0xff]  }
  0x36   :  { %133 = vmatpush1.bf16.msra.mxu0 %v741_v2  ;;  %v745_v5 = vld [vmem:[#allocation7 + $0x70] ss:$8 sps:$4 sm:$0xff]   ;;  %v746_v6 = vld [vmem:[#allocation7 + $0x64] ss:$8 sps:$4 sm:$0xff]   ;;  %371 = vmatprep.subr.bf16.mxu1 %v743_v4  ;;  %v748_v7 = vld [vmem:[#allocation7 + $0x60] ss:$8 sps:$4 sm:$0xff]  }
  0x37   :  { %372 = vmatpush1.bf16.msra.mxu1 %v745_v5  ;;  %v749_v8 = vld [vmem:[#allocation7 + $0x54] ss:$8 sps:$4 sm:$0xff]   ;;  %v751_v9 = vld [vmem:[#allocation7 + $0x50] ss:$8 sps:$4 sm:$0xff]   ;;  %v752_v10 = vld [vmem:[#allocation7 + $0x44] ss:$8 sps:$4 sm:$0xff]  }
  0x38   :  { %373 = vmatprep.subr.bf16.mxu1 %v746_v6  ;;  %v754_v11 = vld [vmem:[#allocation7 + $0x40] ss:$8 sps:$4 sm:$0xff]   ;;  %v755_v12 = vld [vmem:[#allocation7 + $0x34] ss:$8 sps:$4 sm:$0xff]   ;;  %v757_v13 = vld [vmem:[#allocation7 + $0x30] ss:$8 sps:$4 sm:$0xff]  }
  0x39   :  { %648 = vmatmul.mubr.msk.bf16.vlgmr.msra.gmra.mxu0 %vm114_vm0, %v742_v3  ;;  %v758_v14 = vld [vmem:[#allocation7 + $0x24] ss:$8 sps:$4 sm:$0xff]   ;;  %v760_v15 = vld [vmem:[#allocation7 + $0x20] ss:$8 sps:$4 sm:$0xff]   ;;  %v761_v16 = vld [vmem:[#allocation7 + $0x14] ss:$8 sps:$4 sm:$0xff]  }
  0x3a   :  { %v763_v17 = vld [vmem:[#allocation7 + $0x10] ss:$8 sps:$4 sm:$0xff]   ;;  %v764_v18 = vld [vmem:[#allocation7 + $0x4] ss:$8 sps:$4 sm:$0xff]   ;;  %v766_v19 = vld [vmem:[#allocation7] ss:$8 sps:$4 sm:$0xff]  }
  0x3b   :  { %374 = vmatpush1.bf16.msra.mxu1 %v748_v7  ;;  %v767_v20 = vld [vmem:[#allocation7 + $0xf4] ss:$8 sps:$4 sm:$0xff]   ;;  %v769_v21 = vld [vmem:[#allocation7 + $0xf0] ss:$8 sps:$4 sm:$0xff]   ;;  %v770_v22 = vld [vmem:[#allocation7 + $0xe4] ss:$8 sps:$4 sm:$0xff]  }
  0x3c   :  { %375 = vmatprep.subr.bf16.mxu1 %v749_v8  ;;  %v772_v23 = vld [vmem:[#allocation7 + $0xe0] ss:$8 sps:$4 sm:$0xff]   ;;  %v773_v24 = vld [vmem:[#allocation7 + $0xd4] ss:$8 sps:$4 sm:$0xff]   ;;  %v775_v25 = vld [vmem:[#allocation7 + $0xd0] ss:$8 sps:$4 sm:$0xff]  }
  0x3d   :  { %v776_v26 = vld [vmem:[#allocation7 + $0xc4] ss:$8 sps:$4 sm:$0xff]   ;;  %v778_v27 = vld [vmem:[#allocation7 + $0xc0] ss:$8 sps:$4 sm:$0xff]   ;;  %v779_v28 = vld [vmem:[#allocation7 + $0xb4] ss:$8 sps:$4 sm:$0xff]  }
  0x3e   :  { %v781_v29 = vld [vmem:[#allocation7 + $0xb0] ss:$8 sps:$4 sm:$0xff]   ;;  %v782_v30 = vld [vmem:[#allocation7 + $0xa4] ss:$8 sps:$4 sm:$0xff]   ;;  %v784_v31 = vld [vmem:[#allocation7 + $0xa0] ss:$8 sps:$4 sm:$0xff]  }
  0x3f   :  { %376 = vmatpush1.bf16.msra.mxu1 %v751_v9  ;;  %v785_v32 = vld [vmem:[#allocation7 + $0x94] ss:$8 sps:$4 sm:$0xff]   ;;  %v787_v33 = vld [vmem:[#allocation7 + $0x90] ss:$8 sps:$4 sm:$0xff]   ;;  %v788_v34 = vld [vmem:[#allocation7 + $0x84] ss:$8 sps:$4 sm:$0xff]  }
  0x40   :  { %377 = vmatprep.subr.bf16.mxu1 %v752_v10  ;;  %v790_v35 = vld [vmem:[#allocation7 + $0x80] ss:$8 sps:$4 sm:$0xff]   ;;  %v791_v36 = vld [vmem:[#allocation8 + $0x78] sm:$0xff]   ;;  %v793_v38 = vld [vmem:[#allocation8 + $0x70] sm:$0xff]   ;;  %v90_v47 = vshrl.u32 %v89_v46, 7 }
  0x41   :  { %v792_v37 = vld [vmem:[#allocation8 + $0x38] sm:$0xff]   ;;  %707 = vmatprep.subr.bf16.mxu0 %v791_v36  ;;  %v794_v39 = vld [vmem:[#allocation8 + $0x30] sm:$0xff]   ;;  %v796_v41 = vld [vmem:[#allocation8 + $0x28] sm:$0xff]  }
  0x42   :  { %708 = vmatpush3.bf16.msra.mxu0 %v792_v37  ;;  %v797_v42 = vld [vmem:[#allocation8 + $0x60] sm:$0xff]   ;;  %v799_v44 = vld [vmem:[#allocation8 + $0x58] sm:$0xff]   ;;  %v95_v48 = vsub.s32 1, %v90_v47  ;;  %v91_v49 = vsub.s32 0, %v90_v47  ;;  %v87_v50 = vld [vmem:[%s1014_s2] sm:$0x3] }
  0x43   :  { %378 = vmatpush1.bf16.msra.mxu1 %v754_v11  ;;  %709 = vmatprep.subr.bf16.mxu0 %v793_v38  ;;  %v798_v43 = vld [vmem:[#allocation8 + $0x20] sm:$0xff]   ;;  %v800_v45 = vld [vmem:[#allocation8 + $0x18] sm:$0xff]   ;;  %v801_v3 = vld [vmem:[#allocation8 + $0x50] sm:$0xff]  }
  0x44   :  { %379 = vmatprep.subr.bf16.mxu1 %v755_v12  ;;  %v96_v52 = vrot.slane %v87_v50, %v95_v48  ;;  %v92_v53 = vrot.slane %v87_v50, %v91_v49  ;;  %v802_v4 = vld [vmem:[#allocation8 + $0x10] sm:$0xff]   ;;  %v803_v5 = vld [vmem:[#allocation8 + $0x48] sm:$0xff]   ;;  %v805_v7 = vld [vmem:[#allocation8 + $0x40] sm:$0xff]  }
  0x45   :  { %v804_v6 = vld [vmem:[#allocation8 + $0x8] sm:$0xff]   ;;  %v806_v8 = vld [vmem:[#allocation8] sm:$0xff]  }
  0x46   :  { %710 = vmatpush3.bf16.msra.mxu0 %v794_v39  ;;  %v199_v9 = vld [vmem:[%s1016_s4] sm:$0x3] }
  0x47   :  { %380 = vmatpush1.bf16.msra.mxu1 %v757_v13  ;;  %711 = vmatprep.subr.bf16.mxu0 %v795_v40  ;;  %v208_v11 = vrot.slane %v199_v9, %v95_v48  ;;  %v204_v12 = vrot.slane %v199_v9, %v91_v49 }
  0x48   :  { %381 = vmatprep.subr.bf16.mxu1 %v758_v14 }
  0x4a   :  { %712 = vmatpush3.bf16.msra.mxu0 %v796_v41 }
  0x4b   :  { %382 = vmatpush1.bf16.msra.mxu1 %v760_v15  ;;  %713 = vmatprep.subr.bf16.mxu0 %v797_v42 }
  0x4c   :  { %383 = vmatprep.subr.bf16.mxu1 %v761_v16 }
  0x4e   :  { %714 = vmatpush3.bf16.msra.mxu0 %v798_v43 }
  0x4f   :  { %384 = vmatpush1.bf16.msra.mxu1 %v763_v17  ;;  %715 = vmatprep.subr.bf16.mxu0 %v799_v44 }
  0x50   :  { %385 = vmatprep.subr.bf16.mxu1 %v764_v18 }
  0x52   :  { %716 = vmatpush3.bf16.msra.mxu0 %v800_v45 }
  0x53   :  { %386 = vmatpush1.bf16.msra.mxu1 %v766_v19  ;;  %717 = vmatprep.subr.bf16.mxu0 %v801_v3 }
  0x54   :  { %387 = vmatprep.subr.bf16.mxu1 %v767_v20 }
  0x56   :  { %718 = vmatpush3.bf16.msra.mxu0 %v802_v4 }
  0x57   :  { %388 = vmatpush2.bf16.msra.mxu1 %v769_v21  ;;  %719 = vmatprep.subr.bf16.mxu0 %v803_v5 }
  0x58   :  { %389 = vmatprep.subr.bf16.mxu1 %v770_v22 }
  0x5a   :  { %720 = vmatpush3.bf16.msra.mxu0 %v804_v6 }
  0x5b   :  { %390 = vmatpush2.bf16.msra.mxu1 %v772_v23  ;;  %721 = vmatprep.subr.bf16.mxu0 %v805_v7 }
  0x5c   :  { %391 = vmatprep.subr.bf16.mxu1 %v773_v24 }
  0x5e   :  { %722 = vmatpush3.bf16.msra.mxu0 %v806_v8 }
  0x5f   :  { %392 = vmatpush2.bf16.msra.mxu1 %v775_v25 }
  0x60   :  { %393 = vmatprep.subr.bf16.mxu1 %v776_v26 }
  0x63   :  { %394 = vmatpush2.bf16.msra.mxu1 %v778_v27 }
  0x64   :  { %395 = vmatprep.subr.bf16.mxu1 %v779_v28  ;;  %v681_v28 = vld [vmem:[%s1018_s6] ss:$0 sm:$0xff]  ;;  %s932_s6 = smov [#allocation10]  }
  0x65   :  { %s631_s25 = sshll.u32 %s932_s6, 4  ;;  %s632_s25 = int_to_ptr.vmem [resolvable:$true] %s631_s25 }
  0x66   :  { %s895_s26 = scalar_lea.vmem %s632_s25, 128  ;;  %p900_p7 = scmp.lt.s32.totalorder %s632_s25, %s632_s25 }
  0x67   :  { %396 = vmatpush2.bf16.msra.mxu1 %v781_v29  ;;  %p896_p6 = scmp.ne.s32.totalorder %s632_s25, %s895_s26  ;;  %p901_p8 = scmp.lt.s32.totalorder %s895_s26, %s895_s26 }
  0x68   :  { %397 = vmatprep.subr.bf16.mxu1 %v782_v30 }
  0x69   :  { %p902_p9 = por %p901_p8, %p900_p7 }
  0x6b   :  { %398 = vmatpush2.bf16.msra.mxu1 %v784_v31  ;;  %p903_p10 = pnand %p902_p9, %p896_p6 }
  0x6c   :  { %399 = vmatprep.subr.bf16.mxu1 %v785_v32 }
  0x6f   :  { %400 = vmatpush2.bf16.msra.mxu1 %v787_v33 }
  0x70   :  { %401 = vmatprep.subr.bf16.mxu1 %v788_v34 }
  0x73   :  { %402 = vmatpush2.bf16.msra.mxu1 %v790_v35 }
  0xf9   :  { %v152_v51 = vpop.f32.mrf.mxu0 }
  0xfa   :  { %v153_v58 = vadd.f32 %v152_v51, %v92_v53 }
  0xfb   :  { %v154_v54 = vpop.f32.mrf.mxu0 }
  0xfc   :  { %v155_v56 = vadd.f32 %v154_v54, %v96_v52  ;;  %v161_v0 = vmax.f32 %v153_v58, 0.0 }
  0xfd   :  { %v156_v55 = vpop.f32.mrf.mxu0 }
  0xfe   :  { %v157_v57 = vadd.f32 %v156_v55, %v92_v53  ;;  %v162_v62 = vmax.f32 %v155_v56, 0.0 }
  0xff   :  { %v158_v59 = vpop.f32.mrf.mxu0 }
 0x100   :  { %v159_v60 = vadd.f32 %v158_v59, %v96_v52  ;;  %v163_v61 = vmax.f32 %v157_v57, 0.0 }
 0x102   :  { %v164_v63 = vmax.f32 %v159_v60, 0.0  ;;  %v165_v2 = vpack.c.bf16 %v163_v61, %v161_v0 }
 0x104   :  { %v166_v1 = vpack.c.bf16 %v164_v63, %v162_v62 }
 0x106   :  { %403 = vmatprep.mubr.bf16.mxu1 %v166_v1 }
 0x107   :  { %404 = vmatmul.mubr.bf16.vlgmr.msra.gmra.mxu1 %v165_v2 }
 0x1c7   :  { %v405_v10 = vpop.f32.mrf.mxu1 }
 0x1c8   :  { %v406_v17 = vadd.f32 %v405_v10, %v204_v12 }
 0x1c9   :  { %v407_v13 = vpop.f32.mrf.mxu1 }
 0x1ca   :  { %v408_v15 = vadd.f32 %v407_v13, %v208_v11  ;;  %v414_v23 = vmax.f32 %v406_v17, 0.0 }
 0x1cb   :  { %v409_v14 = vpop.f32.mrf.mxu1 }
 0x1cc   :  { %v410_v16 = vadd.f32 %v409_v14, %v204_v12  ;;  %v415_v21 = vmax.f32 %v408_v15, 0.0 }
 0x1cd   :  { %v411_v18 = vpop.f32.mrf.mxu1 }
 0x1ce   :  { %v412_v19 = vadd.f32 %v411_v18, %v208_v11  ;;  %v416_v20 = vmax.f32 %v410_v16, 0.0 }
 0x1d0   :  { %v417_v22 = vmax.f32 %v412_v19, 0.0  ;;  %v418_v25 = vpack.c.bf16 %v416_v20, %v414_v23 }
 0x1d2   :  { %v419_v24 = vpack.c.bf16 %v417_v22, %v415_v21 }
 0x1d4   :  { %587 = vmatprep.mubr.bf16.mxu0 %v419_v24 }
 0x1d5   :  { %588 = vmatmul.mubr.bf16.vlgmr.msra.gmra.mxu0 %v418_v25 }
 0x295   :  { %v723_v26 = vpop.f32.mrf.mxu0 }
 0x297   :  { %v724_v27 = vpop.f32.mrf.mxu0 }
 0x298   :  { %v725_v29 = vadd.f32 %v724_v27, %v723_v26 }
 0x299   :  { %v726_v30 = vpop.f32.mrf.mxu0 }
 0x29a   :  { %v590_v31 = vadd.f32 %v725_v29, %v681_v28 }
 0x29b   :  { %v727_v32 = vpop.f32.mrf.mxu0 }
 0x29c   :  { %v728_v33 = vadd.f32 %v727_v32, %v726_v30  ;;  %596 = vmax.xlane.f32.xlu0 %v590_v31 }
 0x29e   :  { %v593_v34 = vadd.f32 %v728_v33, %v681_v28 }
 0x2a0   :  { %598 = vmax.xlane.f32.xlu0 %v593_v34 }
 0x325   :  { %v597_v35 = vpop.xlane.xlu0 %596 }
 0x326   :  { %v600_v36 = vsub.f32 %v590_v31, %v597_v35 }
 0x328   :  { %v602_v37 = vmul.f32 1.442695, %v600_v36 }
 0x329   :  { %v599_v38 = vpop.xlane.xlu0 %598 }
 0x32a   :  { %807 = vpow2.f32 %v602_v37  ;;  %v601_v39 = vsub.f32 %v593_v34, %v599_v38 }
 0x32c   :  { %v604_v40 = vmul.f32 1.442695, %v601_v39 }
 0x32e   :  { %809 = vpow2.f32 %v604_v40 }
 0x337   :  { %v808_v41 = vpop.eup %807 }
 0x338   :  { %606 = vadd.xlane.f32.xlu1 %v808_v41 }
 0x33b   :  { %v810_v42 = vpop.eup %809 }
 0x33c   :  { %608 = vadd.xlane.f32.xlu1 %v810_v42 }
 0x3c1   :  { %v607_v43 = vpop.xlane.xlu1 %606 }
 0x3c2   :  { %811 = vrcp.f32 %v607_v43 }
 0x3c5   :  { %v609_v44 = vpop.xlane.xlu1 %608 }
 0x3c6   :  { %813 = vrcp.f32 %v609_v44 }
 0x3cf   :  { %v812_v45 = vpop.eup %811 }
 0x3d0   :  { %v614_v47 = vmul.f32 %v812_v45, %v808_v41 }
 0x3d3   :  { %v814_v46 = vpop.eup %813 }
 0x3d4   :  { %v615_v48 = vmul.f32 %v814_v46, %v810_v42 }
 0x3d6   :  { %v705_v49 = vpack.c.bf16 %v615_v48, %v614_v47 }
 0x3d8   :  { %706 = vst [vmem:[#allocation10] sm:$0xff] %v705_v49  }
 0x3d9   :  { %906 = shalt.err (!%p903_p10)
}
 0x3da   :  { %637 = dma.vmem_to_hbm [thread:$0]  %s632_s25, 128, %s1019_s7, [#allocation4], %s927_s11, %s927_s11, %s928_s12  }
 0x3db   :  { %921 = dma.done.wait [#allocation4], 128  }
 0x3dc   :  { %922 = vsyncadd [#allocation4], 4294967168 }
 0x3dd   :  { %641 = vsyncpa [#allocation3], 1 }
 0x3de   :  { %642 = vsyncpa [#allocation6], 1 }
 0x3df   :  { %643 = vsyncpa [#allocation9], 1 }
 0x3e0   :  { %644 = vsyncpa [#allocation4], 1 }

</bundles_post_ra>
